<compile_context>
chip_gen: v5e
topology: v5e:2x2
jax: 0.10.0
libtpu: 0.0.40
codegen_flags: <defaults>
</compile_context>

<pallas_src>
import functools

import jax
import jax.numpy as jnp
import numpy as np
from jax.experimental import pallas as pl
from jax.experimental.pallas import tpu as pltpu

GRAVITY = 9.80665       # m s^-2
RHO_WATER = 1000.0      # kg m^-3
RAD_EARTH = 6371000.0   # m


# ----------------------------------------------------------------------------- #
# VMEM budgets (generation aware)
# ----------------------------------------------------------------------------- #
def _vmem_budgets():
    cap = 64 * 1024 * 1024                      # conservative fallback = v7x per-core VMEM
    try:
        info = pltpu.get_tpu_info()
        cap = int(getattr(info, "vmem_capacity_bytes", cap))
    except Exception:
        pass
    vmem_limit = min(int(cap * 0.70), 100 * 1024 * 1024)   # headroom for compiler scratch
    tile_budget = int(cap * 0.35)                            # working-set budget for blocks
    return vmem_limit, tile_budget


def _pick_lat_tile(H, W, tile_budget_bytes):
    """Largest lat tile whose padded, double-buffered VMEM working set fits the budget.

    Accounts for physical (8,128) vreg-tile padding of each (TH, W) block:
    5 streamed operands x 2 buffers + 2 f32 accumulators ~= 12 blocks.
    TH is a multiple of 16 (clean sublane packing for both f32 and bf16) unless the full
    lat extent already fits, in which case a single full-extent tile is used.
    """
    w_pad = -(-W // 128) * 128

    def footprint(th):
        th_pad = -(-th // 8) * 8
        return 12 * th_pad * w_pad * 4

    if footprint(H) <= tile_budget_bytes:
        return H, 1
    th = (tile_budget_bytes // (12 * w_pad * 4)) // 16 * 16
    th = max(16, min(th, (H // 16) * 16))
    return th, -(-H // th)


# ----------------------------------------------------------------------------- #
# Kernel 1: per-level weighted column-water difference + area-weighted partial
# sums, accumulated across (lat-tile, level) steps; emits the per-batch ratio.
# ----------------------------------------------------------------------------- #
def _water_ratio_kernel(w_ref, qx_ref, qy_ref, pr_ref, ev_ref, area_ref,
                        ratio_ref, num_acc, den_acc, *, H, TH, ragged):
    h = pl.program_id(1)
    l = pl.program_id(2)

    @pl.when((h == 0) & (l == 0))
    def _init():
        num_acc[...] = jnp.zeros_like(num_acc)
        den_acc[...] = jnp.zeros_like(den_acc)

    if ragged:
        # Non-dividing lat tile: neutralize out-of-bounds rows of the last block.
        row = h * TH + jax.lax.broadcasted_iota(jnp.int32, num_acc.shape, 0)
        valid = row < H

        def msk(v):
            return jnp.where(valid, v, 0.0)
    else:
        def msk(v):
            return v

    area = msk(area_ref[...].astype(jnp.float32))                    # (TH, W)
    w_l = w_ref[l]                                                   # scalar weight (SMEM)

    # Per-level weighted difference, accumulated lane/sublane-parallel (no per-step
    # cross-lane reduction).
    qd = msk(qy_ref[...].astype(jnp.float32) - qx_ref[...].astype(jnp.float32))
    num_acc[...] += qd * (w_l * area)

    @pl.when(l == 0)
    def _evap_precip():
        # evapor folded into the numerator field; precip into the denominator.
        num_acc[...] += msk(ev_ref[...].astype(jnp.float32)) * area
        den_acc[...] += msk(pr_ref[...].astype(jnp.float32)) * area

    @pl.when((h == pl.num_programs(1) - 1) & (l == pl.num_programs(2) - 1))
    def _finalize():
        num = jnp.sum(num_acc[...], keepdims=True)                   # (1, 1)
        den = jnp.sum(den_acc[...], keepdims=True)
        # ratio = (P_sum + residual) / P_sum = -(TWC_sum + E_sum) / P_sum
        ratio_ref[...] = jnp.reshape(-(num / den), (1, 1, 1))


def water_fixer_ratio_pallas(x_input, y_pred, area, w, *,
                             q_ind_start, precip_ind, evapor_ind):
    """x_input: (B, Vx, T_in, H, W); y_pred: (B, V, T, H, W); area: (H, W) f32;
    w: (L,) f32 folded trapezoid weights.  Returns (B, 1, 1) f32 correction ratio."""
    B, _, T_in, H, W = x_input.shape
    L = int(w.shape[0])

    vmem_limit, tile_budget = _vmem_budgets()
    TH, n_h = _pick_lat_tile(H, W, tile_budget)
    ragged = (H % TH) != 0

    kernel = functools.partial(_water_ratio_kernel, H=H, TH=TH, ragged=ragged)
    t_last = T_in - 1

    return pl.pallas_call(
        kernel,
        out_shape=jax.ShapeDtypeStruct((B, 1, 1), jnp.float32),
        grid=(B, n_h, L),
        in_specs=[
            # per-level weights, resident in SMEM for the whole call
            pl.BlockSpec(memory_space=pltpu.MemorySpace.SMEM),
            # q_input: one level per step, last input time step
            pl.BlockSpec((None, None, None, TH, W),
                         lambda b, h, l: (b, q_ind_start + l, t_last, h, 0)),
            # q_pred: one level per step, first output time step
            pl.BlockSpec((None, None, None, TH, W),
                         lambda b, h, l: (b, q_ind_start + l, 0, h, 0)),
            # precip / evapor: index independent of l -> fetched once per (b, h)
            pl.BlockSpec((None, None, None, TH, W),
                         lambda b, h, l: (b, precip_ind, 0, h, 0)),
            pl.BlockSpec((None, None, None, TH, W),
                         lambda b, h, l: (b, evapor_ind, 0, h, 0)),
            # grid-cell area
            pl.BlockSpec((TH, W), lambda b, h, l: (h, 0)),
        ],
        out_specs=pl.BlockSpec((1, 1, 1), lambda b, h, l: (b, 0, 0)),
        scratch_shapes=[pltpu.VMEM((TH, W), jnp.float32),    # numerator partials
                        pltpu.VMEM((TH, W), jnp.float32)],   # denominator partials
        compiler_params=pltpu.CompilerParams(
            dimension_semantics=("parallel", "arbitrary", "arbitrary"),
            vmem_limit_bytes=vmem_limit),
    )(w, x_input, y_pred, y_pred, y_pred, area)


# ----------------------------------------------------------------------------- #
# Kernel 2: scale only the precip channel of y_pred, aliased in place.
# ----------------------------------------------------------------------------- #
def _scale_precip_kernel(ratio_ref, y_ref, o_ref):
    b = pl.program_id(0)
    r = ratio_ref[b, 0]                                        # scalar ratio from SMEM
    o_ref[...] = (y_ref[...].astype(jnp.float32) * r).astype(o_ref.dtype)


def scale_precip_pallas(ratio, y_pred, *, precip_ind):
    """ratio: (B, 1) f32.  Returns y_pred with channel precip_ind (time 0) scaled; all other
    channels preserved via the input/output alias (in place under jit + donation)."""
    B, V, T, H, W = y_pred.shape
    vmem_limit, tile_budget = _vmem_budgets()
    TH, n_h = _pick_lat_tile(H, W, tile_budget)

    return pl.pallas_call(
        _scale_precip_kernel,
        out_shape=jax.ShapeDtypeStruct(y_pred.shape, y_pred.dtype),
        grid=(B, n_h),
        in_specs=[
            pl.BlockSpec(memory_space=pltpu.MemorySpace.SMEM),        # ratio (B, 1)
            pl.BlockSpec((None, None, None, TH, W),
                         lambda b, h: (b, precip_ind, 0, h, 0)),
        ],
        out_specs=pl.BlockSpec((None, None, None, TH, W),
                               lambda b, h: (b, precip_ind, 0, h, 0)),
        input_output_aliases={1: 0},
        compiler_params=pltpu.CompilerParams(
            dimension_semantics=("parallel", "parallel"),
            vmem_limit_bytes=vmem_limit),
    )(ratio, y_pred)


# ----------------------------------------------------------------------------- #
# Module wrapper (glue: weight prep, grid area, kernel dispatch)
# ----------------------------------------------------------------------------- #
class GlobalWaterFixerPallas:
    def __init__(self, post_conf):
        assert post_conf['global_water_fixer']['simple_demo']
        assert not post_conf['global_water_fixer']['midpoint']
        # TODO(synk): sigma-level grids, midpoint=True integral and state_trans (denorm)
        #             are not implemented — only the simple_demo pressure-level path.
        y_demo = np.array([90, 70, 50, 30, 10, -10, -30, -50, -70, -90], dtype=np.float64)
        x_demo = np.arange(0, 360, 20, dtype=np.float64)
        lon2d, lat2d = np.meshgrid(x_demo, y_demo)              # (10, 18)
        p_level = np.array([100, 30000, 50000, 70000, 80000, 90000, 100000],
                           dtype=np.float64)

        self.N_levels = len(p_level)
        self.N_seconds = int(post_conf['data']['lead_time_periods']) * 3600  # cancels in ratio
        self.q_ind_start = int(post_conf['global_water_fixer']['q_inds'][0])
        self.q_ind_end = int(post_conf['global_water_fixer']['q_inds'][-1]) + 1
        self.precip_ind = int(post_conf['global_water_fixer']['precip_ind'])
        self.evapor_ind = int(post_conf['global_water_fixer']['evapor_ind'])
        assert self.q_ind_end - self.q_ind_start == self.N_levels

        # Fold trapezoid weights with 1/GRAVITY and 1/RHO_WATER (N_seconds cancels):
        #   ratio = -sum((sum_k w[k]*(q_pred[k]-q_input[k]) + evapor) * area) / sum(precip*area)
        self.dp = np.diff(p_level)                              # kept for the numpy reference
        trap = np.zeros(self.N_levels, dtype=np.float64)
        trap[:-1] += 0.5 * self.dp
        trap[1:] += 0.5 * self.dp
        self.w = jnp.asarray(trap / (GRAVITY * RHO_WATER), dtype=jnp.float32)

        # grid-cell area ~ R^2 * cos(lat) * dlat * dlon (physics_pressure_level.grid_area)
        dlat = np.deg2rad(20.0)
        dlon = np.deg2rad(20.0)
        area2d = np.abs((RAD_EARTH ** 2) * np.cos(np.deg2rad(lat2d)) * dlat * dlon)
        self.area2d = area2d                                    # f64, for the numpy reference
        self.area = jnp.asarray(area2d, dtype=jnp.float32)
        self.H, self.W = lat2d.shape

    def __call__(self, x):
        x_input = x['x']
        y_pred = x['y_pred']
        assert x_input.shape[-2:] == (self.H, self.W)

        ratio = water_fixer_ratio_pallas(
            x_input, y_pred, self.area, self.w,
            q_ind_start=self.q_ind_start,
            precip_ind=self.precip_ind,
            evapor_ind=self.evapor_ind)                         # (B, 1, 1) float32

        # In-place-able precip correction (aliased pallas_call); equivalent to concat_fix
        # with q_ind_start == q_ind_end == precip_ind.
        y_pred_new = scale_precip_pallas(ratio.reshape(ratio.shape[0], 1),
                                         y_pred, precip_ind=self.precip_ind)

        out = dict(x)
        out['y_pred'] = y_pred_new
        return out


# ----------------------------------------------------------------------------- #
# Pure-numpy reference (float64) for correctness check
# ----------------------------------------------------------------------------- #
def _reference_forward(x_input, y_pred, dp, area, n_seconds, qs, qe, p_ind, e_ind):
    x_input = np.asarray(x_input, np.float64)
    y_pred = np.asarray(y_pred, np.float64)
    dp = np.asarray(dp, np.float64)
    area = np.asarray(area, np.float64)

    q_input = x_input[:, qs:qe, -1]
    q_pred = y_pred[:, qs:qe, 0]
    precip = y_pred[:, p_ind, 0]
    evapor = y_pred[:, e_ind, 0]

    precip_flux = precip * RHO_WATER / n_seconds
    evapor_flux = evapor * RHO_WATER / n_seconds

    def twc(q):
        return np.sum(0.5 * (q[:, :-1] + q[:, 1:]) * dp[None, :, None, None],
                      axis=1) / GRAVITY

    dTWC_dt = (twc(q_pred) - twc(q_input)) / n_seconds
    TWC_sum = np.sum(dTWC_dt * area, axis=(-2, -1))
    E_sum = np.sum(evapor_flux * area, axis=(-2, -1))
    P_sum = np.sum(precip_flux * area, axis=(-2, -1))
    residual = -TWC_sum - E_sum - P_sum
    ratio = (P_sum + residual) / P_sum
    precip_c = precip * ratio[:, None, None]

    parts = [y_pred[:, :p_ind], precip_c[:, None, None], y_pred[:, p_ind + 1:]]
    return np.concatenate(parts, axis=1)


if __name__ == "__main__":
    post_conf = {
        'global_water_fixer': {
            'simple_demo': True,
            'midpoint': False,
            'q_inds': list(range(7)),   # 7 specific-humidity levels -> channels 0..6
            'precip_ind': 7,
            'evapor_ind': 8,
        },
        'data': {'lead_time_periods': 6},
    }
    fixer = GlobalWaterFixerPallas(post_conf)

    B, N_vars, T_in, T_out = 2, 10, 2, 1
    H, W = fixer.H, fixer.W     # 10 x 18 demo lat/lon grid

    key = jax.random.PRNGKey(0)
    k1, k2 = jax.random.split(key)
    x_input = jax.random.uniform(k1, (B, N_vars, T_in, H, W), jnp.float32) * 1e-3
    y_pred = jax.random.uniform(k2, (B, N_vars, T_out, H, W), jnp.float32) * 1e-3
    # keep the precip channel positive / away from zero (P_sum is a divisor)
    y_pred = y_pred.at[:, fixer.precip_ind].add(1e-3)

    out = fixer({'x': x_input, 'y_pred': y_pred})
    y_new = jax.block_until_ready(out['y_pred'])

    ref = _reference_forward(np.asarray(x_input), np.asarray(y_pred),
                             fixer.dp, fixer.area2d,
                             fixer.N_seconds, fixer.q_ind_start, fixer.q_ind_end,
                             fixer.precip_ind, fixer.evapor_ind)
    np.testing.assert_allclose(np.asarray(y_new), ref,
                               rtol=1e-3, atol=1e-6 * np.max(np.abs(ref)))
    print("KERNEL_OK")
</pallas_src>

<mosaic_0001>
module attributes {stable_mosaic.version = 11 : i64} {
  func.func @_water_ratio_kernel(%arg0: i32, %arg1: i32, %arg2: i32, %arg3: memref<7xf32, #tpu.memory_space<smem>>, %arg4: memref<1x1x1x10x18xf32, #tpu.memory_space<vmem>>, %arg5: memref<1x1x1x10x18xf32, #tpu.memory_space<vmem>>, %arg6: memref<1x1x1x10x18xf32, #tpu.memory_space<vmem>>, %arg7: memref<1x1x1x10x18xf32, #tpu.memory_space<vmem>>, %arg8: memref<10x18xf32, #tpu.memory_space<vmem>>, %arg9: memref<1x1x1xf32, #tpu.memory_space<vmem>>, %arg10: memref<10x18xf32, #tpu.memory_space<vmem>>, %arg11: memref<10x18xf32, #tpu.memory_space<vmem>>) attributes {dimension_semantics = [#tpu.dimension_semantics<parallel>, #tpu.dimension_semantics<arbitrary>, #tpu.dimension_semantics<arbitrary>], iteration_bounds = array<i64: 2, 1, 7>, scalar_prefetch = 0 : i64, scratch_operands = 2 : i64, tpu.core_type = #tpu.core_type<tc>, window_params = [{transform_indices = @transform_0, window_bounds = array<i64: 7>}, {transform_indices = @transform_1, window_bounds = array<i64: 1, 1, 1, 10, 18>}, {transform_indices = @transform_2, window_bounds = array<i64: 1, 1, 1, 10, 18>}, {transform_indices = @transform_3, window_bounds = array<i64: 1, 1, 1, 10, 18>}, {transform_indices = @transform_4, window_bounds = array<i64: 1, 1, 1, 10, 18>}, {transform_indices = @transform_5, window_bounds = array<i64: 10, 18>}, {transform_indices = @transform_6, window_bounds = array<i64: 1, 1, 1>}]} {
    %c0_i32 = arith.constant 0 : i32
    %0 = arith.cmpi eq, %arg1, %c0_i32 : i32
    %c0_i32_0 = arith.constant 0 : i32
    %1 = arith.cmpi eq, %arg2, %c0_i32_0 : i32
    %2 = arith.andi %0, %1 : i1
    %3 = arith.extui %2 : i1 to i32
    %c0_i32_1 = arith.constant 0 : i32
    %4 = arith.cmpi ne, %3, %c0_i32_1 : i32
    scf.if %4 {
      %cst = arith.constant 0.000000e+00 : f32
      %27 = vector.broadcast %cst : f32 to vector<10x18xf32>
      %c0_21 = arith.constant 0 : index
      %c0_22 = arith.constant 0 : index
      %28 = vector.load %arg10[%c0_21, %c0_22] : memref<10x18xf32, #tpu.memory_space<vmem>>, vector<10x18xf32>
      tpu.vector_store %arg10[%c0_21, %c0_22], %27 {strides = array<i32>} : memref<10x18xf32, #tpu.memory_space<vmem>>, vector<10x18xf32>,
      %cst_23 = arith.constant 0.000000e+00 : f32
      %29 = vector.broadcast %cst_23 : f32 to vector<10x18xf32>
      %c0_24 = arith.constant 0 : index
      %c0_25 = arith.constant 0 : index
      %30 = vector.load %arg11[%c0_24, %c0_25] : memref<10x18xf32, #tpu.memory_space<vmem>>, vector<10x18xf32>
      tpu.vector_store %arg11[%c0_24, %c0_25], %29 {strides = array<i32>} : memref<10x18xf32, #tpu.memory_space<vmem>>, vector<10x18xf32>,
    } else {
    }
    %c0 = arith.constant 0 : index
    %c0_2 = arith.constant 0 : index
    %5 = vector.load %arg8[%c0, %c0_2] : memref<10x18xf32, #tpu.memory_space<vmem>>, vector<10x18xf32>
    %6 = arith.index_cast %arg2 : i32 to index
    %7 = memref.load %arg3[%6] : memref<7xf32, #tpu.memory_space<smem>>
    %c0_3 = arith.constant 0 : index
    %c0_4 = arith.constant 0 : index
    %c0_5 = arith.constant 0 : index
    %c0_6 = arith.constant 0 : index
    %c0_7 = arith.constant 0 : index
    %8 = vector.load %arg5[%c0_3, %c0_4, %c0_5, %c0_6, %c0_7] : memref<1x1x1x10x18xf32, #tpu.memory_space<vmem>>, vector<1x1x1x10x18xf32>
    %9 = vector.shape_cast %8 : vector<1x1x1x10x18xf32> to vector<10x18xf32>
    %c0_8 = arith.constant 0 : index
    %c0_9 = arith.constant 0 : index
    %c0_10 = arith.constant 0 : index
    %c0_11 = arith.constant 0 : index
    %c0_12 = arith.constant 0 : index
    %10 = vector.load %arg4[%c0_8, %c0_9, %c0_10, %c0_11, %c0_12] : memref<1x1x1x10x18xf32, #tpu.memory_space<vmem>>, vector<1x1x1x10x18xf32>
    %11 = vector.shape_cast %10 : vector<1x1x1x10x18xf32> to vector<10x18xf32>
    %12 = arith.subf %9, %11 : vector<10x18xf32>
    %c0_13 = arith.constant 0 : index
    %c0_14 = arith.constant 0 : index
    %13 = vector.load %arg10[%c0_13, %c0_14] : memref<10x18xf32, #tpu.memory_space<vmem>>, vector<10x18xf32>
    %14 = vector.broadcast %7 : f32 to vector<10x18xf32>
    %15 = arith.mulf %14, %5 : vector<10x18xf32>
    %16 = arith.mulf %12, %15 : vector<10x18xf32>
    %17 = arith.addf %13, %16 : vector<10x18xf32>
    %c0_15 = arith.constant 0 : index
    %c0_16 = arith.constant 0 : index
    %18 = vector.load %arg10[%c0_15, %c0_16] : memref<10x18xf32, #tpu.memory_space<vmem>>, vector<10x18xf32>
    tpu.vector_store %arg10[%c0_15, %c0_16], %17 {strides = array<i32>} : memref<10x18xf32, #tpu.memory_space<vmem>>, vector<10x18xf32>,
    %c0_i32_17 = arith.constant 0 : i32
    %19 = arith.cmpi eq, %arg2, %c0_i32_17 : i32
    %20 = arith.extui %19 : i1 to i32
    %c0_i32_18 = arith.constant 0 : i32
    %21 = arith.cmpi ne, %20, %c0_i32_18 : i32
    scf.if %21 {
      %c0_21 = arith.constant 0 : index
      %c0_22 = arith.constant 0 : index
      %27 = vector.load %arg10[%c0_21, %c0_22] : memref<10x18xf32, #tpu.memory_space<vmem>>, vector<10x18xf32>
      %c0_23 = arith.constant 0 : index
      %c0_24 = arith.constant 0 : index
      %c0_25 = arith.constant 0 : index
      %c0_26 = arith.constant 0 : index
      %c0_27 = arith.constant 0 : index
      %28 = vector.load %arg7[%c0_23, %c0_24, %c0_25, %c0_26, %c0_27] : memref<1x1x1x10x18xf32, #tpu.memory_space<vmem>>, vector<1x1x1x10x18xf32>
      %29 = vector.shape_cast %28 : vector<1x1x1x10x18xf32> to vector<10x18xf32>
      %30 = arith.mulf %29, %5 : vector<10x18xf32>
      %31 = arith.addf %27, %30 : vector<10x18xf32>
      %c0_28 = arith.constant 0 : index
      %c0_29 = arith.constant 0 : index
      %32 = vector.load %arg10[%c0_28, %c0_29] : memref<10x18xf32, #tpu.memory_space<vmem>>, vector<10x18xf32>
      tpu.vector_store %arg10[%c0_28, %c0_29], %31 {strides = array<i32>} : memref<10x18xf32, #tpu.memory_space<vmem>>, vector<10x18xf32>,
      %c0_30 = arith.constant 0 : index
      %c0_31 = arith.constant 0 : index
      %33 = vector.load %arg11[%c0_30, %c0_31] : memref<10x18xf32, #tpu.memory_space<vmem>>, vector<10x18xf32>
      %c0_32 = arith.constant 0 : index
      %c0_33 = arith.constant 0 : index
      %c0_34 = arith.constant 0 : index
      %c0_35 = arith.constant 0 : index
      %c0_36 = arith.constant 0 : index
      %34 = vector.load %arg6[%c0_32, %c0_33, %c0_34, %c0_35, %c0_36] : memref<1x1x1x10x18xf32, #tpu.memory_space<vmem>>, vector<1x1x1x10x18xf32>
      %35 = vector.shape_cast %34 : vector<1x1x1x10x18xf32> to vector<10x18xf32>
      %36 = arith.mulf %35, %5 : vector<10x18xf32>
      %37 = arith.addf %33, %36 : vector<10x18xf32>
      %c0_37 = arith.constant 0 : index
      %c0_38 = arith.constant 0 : index
      %38 = vector.load %arg11[%c0_37, %c0_38] : memref<10x18xf32, #tpu.memory_space<vmem>>, vector<10x18xf32>
      tpu.vector_store %arg11[%c0_37, %c0_38], %37 {strides = array<i32>} : memref<10x18xf32, #tpu.memory_space<vmem>>, vector<10x18xf32>,
    } else {
    }
    %c0_i32_19 = arith.constant 0 : i32
    %22 = arith.cmpi eq, %arg1, %c0_i32_19 : i32
    %c6_i32 = arith.constant 6 : i32
    %23 = arith.cmpi eq, %arg2, %c6_i32 : i32
    %24 = arith.andi %22, %23 : i1
    %25 = arith.extui %24 : i1 to i32
    %c0_i32_20 = arith.constant 0 : i32
    %26 = arith.cmpi ne, %25, %c0_i32_20 : i32
    scf.if %26 {
      %c0_21 = arith.constant 0 : index
      %c0_22 = arith.constant 0 : index
      %27 = vector.load %arg10[%c0_21, %c0_22] : memref<10x18xf32, #tpu.memory_space<vmem>>, vector<10x18xf32>
      %28 = vector.shape_cast %27 : vector<10x18xf32> to vector<1x10x18xf32>
      %cst = arith.constant dense<0.000000e+00> : vector<1xf32>
      %29 = vector.multi_reduction <add>, %28, %cst [1, 2] : vector<1x10x18xf32> to vector<1xf32>
      %30 = vector.shape_cast %29 : vector<1xf32> to vector<1x1x1xf32>
      %31 = vector.extract %30[0, 0, 0] : f32 from vector<1x1x1xf32>
      %32 = vector.broadcast %31 : f32 to vector<1x1xf32>
      %c0_23 = arith.constant 0 : index
      %c0_24 = arith.constant 0 : index
      %33 = vector.load %arg11[%c0_23, %c0_24] : memref<10x18xf32, #tpu.memory_space<vmem>>, vector<10x18xf32>
      %34 = vector.shape_cast %33 : vector<10x18xf32> to vector<1x10x18xf32>
      %cst_25 = arith.constant dense<0.000000e+00> : vector<1xf32>
      %35 = vector.multi_reduction <add>, %34, %cst_25 [1, 2] : vector<1x10x18xf32> to vector<1xf32>
      %36 = vector.shape_cast %35 : vector<1xf32> to vector<1x1x1xf32>
      %37 = vector.extract %36[0, 0, 0] : f32 from vector<1x1x1xf32>
      %38 = vector.broadcast %37 : f32 to vector<1x1xf32>
      %39 = arith.divf %32, %38 : vector<1x1xf32>
      %cst_26 = arith.constant 0.000000e+00 : f32
      %40 = vector.broadcast %cst_26 : f32 to vector<1x1xf32>
      %41 = arith.subf %40, %39 : vector<1x1xf32>
      %42 = vector.shape_cast %41 : vector<1x1xf32> to vector<1x1x1xf32>
      %c0_27 = arith.constant 0 : index
      %c0_28 = arith.constant 0 : index
      %c0_29 = arith.constant 0 : index
      %43 = vector.load %arg9[%c0_27, %c0_28, %c0_29] : memref<1x1x1xf32, #tpu.memory_space<vmem>>, vector<1x1x1xf32>
      tpu.vector_store %arg9[%c0_27, %c0_28, %c0_29], %42 {strides = array<i32>} : memref<1x1x1xf32, #tpu.memory_space<vmem>>, vector<1x1x1xf32>,
    } else {
    }
    return
  }
  func.func @transform_0(%arg0: i32, %arg1: i32, %arg2: i32) -> i32 {
    %c0_i32 = arith.constant 0 : i32
    %c0_i32_0 = arith.constant 0 : i32
    return %c0_i32 : i32
  }
  func.func @transform_1(%arg0: i32, %arg1: i32, %arg2: i32) -> (i32, i32, i32, i32, i32) {
    %c0_i32 = arith.constant 0 : i32
    %0 = arith.addi %c0_i32, %arg2 : i32
    %c1_i32 = arith.constant 1 : i32
    %c0_i32_0 = arith.constant 0 : i32
    %c0_i32_1 = arith.constant 0 : i32
    return %arg0, %0, %c1_i32, %arg1, %c0_i32_0 : i32, i32, i32, i32, i32
  }
  func.func @transform_2(%arg0: i32, %arg1: i32, %arg2: i32) -> (i32, i32, i32, i32, i32) {
    %c0_i32 = arith.constant 0 : i32
    %0 = arith.addi %c0_i32, %arg2 : i32
    %c0_i32_0 = arith.constant 0 : i32
    %c0_i32_1 = arith.constant 0 : i32
    %c0_i32_2 = arith.constant 0 : i32
    return %arg0, %0, %c0_i32_0, %arg1, %c0_i32_1 : i32, i32, i32, i32, i32
  }
  func.func @transform_3(%arg0: i32, %arg1: i32, %arg2: i32) -> (i32, i32, i32, i32, i32) {
    %c7_i32 = arith.constant 7 : i32
    %c0_i32 = arith.constant 0 : i32
    %c0_i32_0 = arith.constant 0 : i32
    %c0_i32_1 = arith.constant 0 : i32
    return %arg0, %c7_i32, %c0_i32, %arg1, %c0_i32_0 : i32, i32, i32, i32, i32
  }
  func.func @transform_4(%arg0: i32, %arg1: i32, %arg2: i32) -> (i32, i32, i32, i32, i32) {
    %c8_i32 = arith.constant 8 : i32
    %c0_i32 = arith.constant 0 : i32
    %c0_i32_0 = arith.constant 0 : i32
    %c0_i32_1 = arith.constant 0 : i32
    return %arg0, %c8_i32, %c0_i32, %arg1, %c0_i32_0 : i32, i32, i32, i32, i32
  }
  func.func @transform_5(%arg0: i32, %arg1: i32, %arg2: i32) -> (i32, i32) {
    %c0_i32 = arith.constant 0 : i32
    %c0_i32_0 = arith.constant 0 : i32
    return %arg1, %c0_i32 : i32, i32
  }
  func.func @transform_6(%arg0: i32, %arg1: i32, %arg2: i32) -> (i32, i32, i32) {
    %c0_i32 = arith.constant 0 : i32
    %c0_i32_0 = arith.constant 0 : i32
    %c0_i32_1 = arith.constant 0 : i32
    return %arg0, %c0_i32, %c0_i32_0 : i32, i32, i32
  }
}

</mosaic_0001>

<bundles_post_ra>
// kernel: tpu_custom_call.1
= control target key start
LH: loop header
LB: loop body
LE: loop exit
PB: predicated region body
PF: predicated region fallthrough
CT: control target
= control target key end

     0   :  { %s1035_s0 = inlined_call_operand.vmem [shape: f32[7], index: 0, kind: input, shape index: {}]   ;;  %s1036_s1 = inlined_call_operand.vmem [shape: f32[2,10,2,10,18], index: 1, kind: input, shape index: {}]   ;;  %s1037_s2 = inlined_call_operand.vmem [shape: f32[2,10,1,10,18], index: 2, kind: input, shape index: {}]   ;;  %s1038_s3 = inlined_call_operand.vmem [shape: f32[2,10,1,10,18], index: 3, kind: input, shape index: {}]   ;;  %s1039_s4 = inlined_call_operand.vmem [shape: f32[2,10,1,10,18], index: 4, kind: input, shape index: {}]   ;;  %s1040_s5 = inlined_call_operand.vmem [shape: f32[10,18], index: 5, kind: input, shape index: {}]   ;;  %s1041_s6 = inlined_call_operand.vmem [shape: f32[2,1,1], index: 6, kind: output, shape index: {}]  }
   0x1   :  { %1042 = sst [smem:[#allocation9_spill]] %s1035_s0 }
   0x2   :  { %11 = vsyncpa [#allocation5], 0  ;;  %s926_s21 = smov 0   ;;  %s928_s22 = smov 0  }
   0x3   :  { %s930_s23 = smov 0   ;;  %s932_s24 = smov 0  }
   0x4   :  { %s934_s25 = smov 0  }
   0x5 LB: > { %s744_s26 = sadd.s32 4294967295, %s887_s25   ;;  %s29_s27 = sadd.s32 1, %s879_s23  ;;  %s887_s25 = sphi %s934_s25, %s17_s25   ;;  %s883_s24 = sphi %s932_s24, %s1051_s24   ;;  %s879_s23 = sphi %s930_s23, %s1050_s23   ;;  %s875_s22 = sphi %s928_s22, %s1049_s22   ;;  %s871_s21 = sphi %s926_s21, %s1048_s21  }
   0x6   : > { %p30_p0 = scmp.ge.s32.totalorder %s29_s27, 7  ;;  %s36_s28 = sadd.s32 1, %s883_s24 }
   0x7   : > { %p746_p1 = scmp.ge.s32.totalorder %s887_s25, 1  ;;  %p230_p2 = scmp.lt.s32.totalorder %s887_s25, 15 }
   0x8   : > { %s1053_s27 = smov (%p30_p0, %s29_s27), 0  ;;  %s1055_s28 = smov (!%p30_p0, %s36_s28), %s883_s24 }
   0x9   : > { %1043 = sst [smem:[#allocation7_spill]] %s1053_s27  ;;  %p231_p3 = pnand %p746_p1, %p230_p2 }
   0xa   : > { %p38_p4 = scmp.ge.s32.totalorder %s1055_s28, 2  ;;  %p784_p5 = scmp.eq.s32.totalorder %s744_s26, 0 }
   0xb   : > { %p780_p6 = pneg %p231_p3  ;;  %s1044_s0 = sld [smem:[#allocation9_spill]] }
   0xc   : > { %s1057_s28 = smov (%p38_p4, %s1055_s28), 0  ;;  %s889_s8 = smov [#allocation4]  }
   0xd   : > { %1045 = sst [smem:[#allocation8_spill]] %s1057_s28  ;;  %p781_p7 = pnand %p784_p5, %p780_p6 }
   0xe   : > { %327 = sbr.rel (%p231_p3) target bundleno = 282 (0x11a), region = 44 }
  0x11   : > { %s242_s7 = sshll.u32 %s1044_s0, 4  ;;  %s243_s7 = int_to_ptr.vmem [resolvable:$true] %s242_s7 }
  0x12   : > { %783 = dma.vmem_to_smem (!%p781_p7), %s243_s7, 16, %s889_s8, [#allocation5]  }
  0x13   : > { %866 = dma.done.wait (%p784_p5), [#allocation5], 16  }
  0x14   : > { %868 = vsyncadd (%p784_p5), [#allocation5], 4294967280 }
  0x15   : > { %334 = sfence }
  0x16   : > { %p405_p8 = scmp.lt.s32.totalorder %s875_s22, 1  ;;  %p407_p9 = scmp.lt.s32.totalorder %s871_s21, 9 }
  0x17   : > { %p465_p10 = scmp.eq.s32.totalorder %s871_s21, 0 }
  0x18   : > { %s1059_s22 = smov (!%p405_p8, %s875_s22), 1  ;;  %vm470_vm0 = vcmask (%p465_p10), 146432   ;;  %vm472_vm1 = vcmask (%p465_p10), 140288   ;;  %v890_v0 = vmov (%p465_p10), 0.0  }
  0x19   : > { %s408_s9 = scalar_select %p407_p9, %s871_s21, 9  ;;  %471 = vst.msk [vmem:[#allocation2] sm:$0xff] (%p465_p10), %vm470_vm0, %v890_v0 }
  0x1a   : > { %s647_s10 = smul.u32 40, %s1059_s22  ;;  %s463_s13 = scalar_lea.vmem %s1041_s6, %s1059_s22  ;;  %474 = vst.msk [vmem:[#allocation3] sm:$0xff] (%p465_p10), %vm470_vm0, %v890_v0 }
  0x1b   : > { %s752_s14 = sshll.u32 %s408_s9, 2  ;;  %s754_s15 = sshll.u32 %s408_s9, 1  ;;  %473 = vst.msk [vmem:[#allocation2 + $0x8] sm:$0x3] (%p465_p10), %vm472_vm1, %v890_v0 }
  0x1c   : > { %s648_s16 = sadd.s32 %s752_s14, %s647_s10  ;;  %s771_s17 = smul.u32 20, %s1059_s22  ;;  %475 = vst.msk [vmem:[#allocation3 + $0x8] sm:$0x3] (%p465_p10), %vm472_vm1, %v890_v0 }
  0x1d   : > { %s753_s18 = sshll.u32 %s648_s16, 3  ;;  %s756_s19 = smul.u32 160, %s1059_s22 }
  0x1e   : > { %s650_s29 = scalar_lea.vmem %s1036_s1, %s753_s18  ;;  %s429_s30 = sadd.s32 %s771_s17, %s754_s15 }
  0x1f   : > { %s755_s7 = sshll.u32 %s429_s30, 3  ;;  %s980_s28 = scalar_lea.vmem %s1038_s3, %s756_s19 }
  0x20   : > { %s431_s12 = scalar_lea.vmem %s1037_s2, %s755_s7  ;;  %s988_s14 = scalar_lea.vmem %s1039_s4, %s756_s19 }
  0x21   : > { %469 = sbr.rel (!%p465_p10) target bundleno = 38 (0x26), region = 52 }
  0x26 PF: > { %s478_s0 = sld [smem:[#allocation4 + %s871_s21]]  ;;  %v479_v1 = vld [vmem:[%s431_s12] sm:$0xff]  ;;  %v759_v2 = vld [vmem:[%s650_s29 + $0x10] sm:$0xff]  ;;  %v480_v3 = vld [vmem:[%s431_s12 + $0x8] sm:$0x3]  ;;  %vm494_vm2 = vcmask 146432  }
  0x27   : > { %v760_v4 = vld [vmem:[%s650_s29 + $0x18] sm:$0x3]  ;;  %v476_v5 = vld [vmem:[%s1040_s5] sm:$0xff]  ;;  %v477_v6 = vld [vmem:[%s1040_s5 + $0x8] sm:$0x3]  ;;  %v483_v7 = vsub.f32 %v479_v1, %v759_v2  ;;  %vm496_vm3 = vcmask 140288  }
  0x28   : > { %v484_v8 = vsub.f32 %v480_v3, %v760_v4  ;;  %v485_v12 = vld [vmem:[#allocation2] sm:$0xff]  ;;  %v486_v13 = vld [vmem:[#allocation2 + $0x8] sm:$0x3]  ;;  %p761_p11 = scmp.ne.s32.totalorder %s871_s21, 0 }
  0x2c   : > { %v487_v9 = vstv %s478_s0 }
  0x2d   : > { %v488_v10 = vmul.f32 %v487_v9, %v476_v5  ;;  %v489_v11 = vmul.f32 %v487_v9, %v477_v6 }
  0x2f   : > { %v490_v14 = vmul.f32 %v488_v10, %v483_v7  ;;  %v491_v15 = vmul.f32 %v489_v11, %v484_v8 }
  0x30   : > { %500 = sbr.rel (%p761_p11) target bundleno = 63 (0x3f), region = 56 }
  0x31   : > { %v492_v16 = vadd.f32 %v490_v14, %v485_v12  ;;  %v493_v17 = vadd.f32 %v491_v15, %v486_v13 }
  0x33   : > { %495 = vst.msk [vmem:[#allocation2] sm:$0xff] %vm494_vm2, %v492_v16 }
  0x34   : > { %497 = vst.msk [vmem:[#allocation2 + $0x8] sm:$0x3] %vm496_vm3, %v493_v17 }
  0x35   : > { %v762_v19 = vld [vmem:[%s988_s14 + $0x80] sm:$0xff]  ;;  %v763_v22 = vld [vmem:[%s988_s14 + $0x88] sm:$0x3]  ;;  %v511_v23 = vld [vmem:[#allocation3] sm:$0xff] }
  0x36   : > { %v505_v21 = vmul.f32 %v762_v19, %v476_v5  ;;  %v764_v24 = vld [vmem:[%s980_s28 + $0x70] sm:$0xff]  ;;  %v506_v25 = vmul.f32 %v763_v22, %v477_v6  ;;  %v512_v27 = vld [vmem:[#allocation3 + $0x8] sm:$0x3] }
  0x37   : > { %v515_v26 = vmul.f32 %v764_v24, %v476_v5  ;;  %v765_v28 = vld [vmem:[%s980_s28 + $0x78] sm:$0x3] }
  0x38   : > { %v516_v30 = vmul.f32 %v765_v28, %v477_v6 }
  0x39   : > { %v517_v32 = vadd.f32 %v515_v26, %v511_v23 }
  0x3a   : > { %v501_v18 = vld [vmem:[#allocation2] sm:$0xff]  ;;  %v518_v33 = vadd.f32 %v516_v30, %v512_v27 }
  0x3b   : > { %v502_v20 = vld [vmem:[#allocation2 + $0x8] sm:$0x3]  ;;  %v507_v29 = vadd.f32 %v505_v21, %v501_v18  ;;  %519 = vst.msk [vmem:[#allocation3] sm:$0xff] %vm494_vm2, %v517_v32 }
  0x3c   : > { %v508_v31 = vadd.f32 %v506_v25, %v502_v20  ;;  %520 = vst.msk [vmem:[#allocation3 + $0x8] sm:$0x3] %vm496_vm3, %v518_v33 }
  0x3d   : > { %509 = vst.msk [vmem:[#allocation2] sm:$0xff] %vm494_vm2, %v507_v29 }
  0x3e   : > { %510 = vst.msk [vmem:[#allocation2 + $0x8] sm:$0x3] %vm496_vm3, %v508_v31 }
  0x3f PF: > { %p521_p12 = scmp.eq.s32.totalorder %s871_s21, 6 }
  0x40   : > { %vm572_vm8 = vcmask (%p521_p12), 0  }
  0x41   : > { %525 = sbr.rel (!%p521_p12) target bundleno = 282 (0x11a), region = 60 }
  0x42   : > { %v541_v39 = vld [vmem:[#allocation3] sm:$0xff] (%p521_p12) }
  0x43   : > { %v542_v40 = vld [vmem:[#allocation3 + $0x8] sm:$0x3] (%p521_p12)  ;;  %v543_v41 = vsel (%p521_p12), %vm494_vm2, %v541_v39, 0.0 }
  0x44   : > { %v526_v34 = vld [vmem:[#allocation2] sm:$0xff] (%p521_p12)  ;;  %v544_v42 = vsel (%p521_p12), %vm496_vm3, %v542_v40, 0.0 }
  0x45   : > { %v527_v35 = vld [vmem:[#allocation2 + $0x8] sm:$0x3] (%p521_p12)  ;;  %v528_v36 = vsel (%p521_p12), %vm494_vm2, %v526_v34, 0.0  ;;  %v545_v43 = vadd.f32 (%p521_p12), %v544_v42, %v543_v41 }
  0x46   : > { %v529_v37 = vsel %vm496_vm3, %v527_v35, 0.0 }
  0x47   : > { %v530_v38 = vadd.f32 %v529_v37, %v528_v36 }
  0x49   : > { %531 = vadd.xlane.f32.xlu0 %v530_v38 }
  0x51   : > { %546 = vadd.xlane.f32.xlu0 %v545_v43 }
  0xbc   : > { %v532_v44 = vpop.xlane.xlu0 %531 }
  0xbd   : > { %v533_v45 = vrot.slane %v532_v44, 4 }
  0xbf   : > { %v534_v46 = vadd.f32 %v533_v45, %v532_v44 }
  0xc1   : > { %v535_v47 = vrot.slane %v534_v46, 2 }
  0xc3   : > { %v536_v48 = vadd.f32 %v535_v47, %v534_v46 }
  0xc4   : > { %v547_v49 = vpop.xlane.xlu0 %546 }
  0xc5   : > { %v548_v50 = vrot.slane %v547_v49, 4  ;;  %v537_v51 = vrot.slane %v536_v48, 1 }
  0xc7   : > { %v549_v52 = vadd.f32 %v548_v50, %v547_v49  ;;  %v538_v53 = vadd.f32 %v537_v51, %v536_v48 }
  0xc9   : > { %v550_v54 = vrot.slane %v549_v52, 2  ;;  %772 = vpush %v538_v53 }
  0xcb   : > { %v551_v55 = vadd.f32 %v550_v54, %v549_v52 }
  0xcd   : > { %v552_v56 = vrot.slane %v551_v55, 1 }
  0xcf   : > { %v553_v57 = vadd.f32 %v552_v56, %v551_v55 }
  0xd1   : > { %774 = vpush %v553_v57 }
  0xfa   : > { %s773_s21 = spop %772 }
  0xfb   : > { %v540_v4 = vstv %s773_s21 }
 0x102   : > { %s775_s28 = spop %774 }
 0x103   : > { %v555_v58 = vstv %s775_s28 }
 0x104   : > { %828 = vrcp.f32 %v555_v58  ;;  %v567_v62 = vand.u32 2147483648, %v555_v58  ;;  %v565_v0 = vand.u32 2147483647, %v555_v58  ;;  %vm561_vm5 = vweird.f32 %v555_v58 }
 0x106   : > { %v568_v2 = vor.u32 1.1754944e-38, %v567_v62  ;;  %vm566_vm7 = vcmp.eq.f32.partialorder %v565_v0, 8.507059e+37 }
 0x10a   : > { %v829_v59 = vpop.eup %828 }
 0x10b   : > { %v557_v60 = vmul.f32 %v829_v59, %v555_v58  ;;  %vm562_vm4 = vweird.f32 %v829_v59 }
 0x10c   : > { %vm563_vm6 = vmor %vm561_vm5, %vm562_vm4 }
 0x10d   : > { %v558_v61 = vsub.f32 1.0, %v557_v60 }
 0x10f   : > { %v559_v63 = vmul.f32 %v829_v59, %v558_v61 }
 0x111   : > { %v560_v1 = vadd.f32 %v829_v59, %v559_v63 }
 0x113   : > { %v564_v3 = vsel %vm563_vm6, %v829_v59, %v560_v1 }
 0x114   : > { %v569_v5 = vsel %vm566_vm7, %v568_v2, %v564_v3 }
 0x115   : > { %v570_v6 = vmul.f32 %v569_v5, %v540_v4 }
 0x117   : > { %v571_v7 = vsub.f32 0.0, %v570_v6 }
 0x119   : > { %573 = vst.msk [vmem:[%s463_s13] sm:$0x1] %vm572_vm8, %v571_v7 }
 0x11a PF: > { %s17_s25 = sadd.s32 1, %s887_s25   ;;  %s1046_s20 = sld [smem:[#allocation7_spill]] }
 0x11b   : > { %p14_p13 = scmp.ge.s32.totalorder %s17_s25, 16   ;;  %s1047_s26 = sld [smem:[#allocation8_spill]] }
 0x11c   : > { %s1048_s21 = smov %s879_s23  ;;  %s1049_s22 = smov %s883_s24 }
 0x11d   :  { %16 = sbr.rel (!%p14_p13) target bundleno = 5 (0x5), region = 103 }
 0x120   : > { %s1050_s23 = smov %s1046_s20 }
 0x121   : > { %s1051_s24 = smov %s1047_s26 }
 0x122   :  { %591 = vsyncpa [#allocation5], 1 }
 0x123   :  { %593 = vsyncpa [#allocation5 + $0x1], 1 }

</bundles_post_ra>
